<compile_context>
chip_gen: v6e
topology: v6e:2x2x1
jax: 0.10.0
libtpu: 0.0.40
codegen_flags: <defaults>
</compile_context>

<pallas_src>
import math

import jax
import jax.numpy as jnp
from jax.experimental import pallas as pl
from jax.experimental.pallas import tpu as pltpu

MAX_LEN = 256

# ~1 MiB of x per grid step: big enough to amortize the ~0.35 us per-step
# overhead (matters most on v7x's ~3.2 TB/s HBM), small enough that the
# double-buffered x/pe/out blocks stay well under the scoped VMEM default.
_TARGET_BLOCK_BYTES = 1 << 20
# Below this, let XLA fuse the add into neighbouring ops instead of paying a
# pallas_call launch.
_PALLAS_MIN_BYTES = 1 << 18


def make_pe_table(d_model: int, max_len: int = MAX_LEN) -> jnp.ndarray:
    """Sinusoidal table, shape (max_len, 1, d_model), f32 — matches torch."""
    position = jnp.arange(max_len, dtype=jnp.float32)[:, None]          # (L, 1)
    div_term = jnp.exp(
        jnp.arange(0, d_model, 2, dtype=jnp.float32)
        * (-math.log(10000.0) / d_model)
    )                                                                    # (D/2,)
    pe = jnp.zeros((max_len, d_model), dtype=jnp.float32)
    pe = pe.at[:, 0::2].set(jnp.sin(position * div_term))
    pe = pe.at[:, 1::2].set(jnp.cos(position * div_term))
    return pe[:, None, :]                                                # (L, 1, D)


def _add_kernel(x_ref, pe_ref, o_ref):
    # Same-shape, lane-dense tiles -> pure VPU elementwise add, unmasked stores.
    o_ref[...] = x_ref[...] + pe_ref[...]


def _lane_dense_layout(total: int):
    """Pick a (rows, cols) 2-D layout with cols a multiple of 128.

    Prefers the largest cols that still yields rows >= 8 (dense sublanes AND
    a wide, unmasked lane dimension); otherwise the layout with the most rows.
    Returns None if the element count isn't a multiple of 128.
    """
    fallback = None
    for cols in (1024, 512, 256, 128):
        if total % cols == 0:
            rows = total // cols
            if rows >= 8:
                return rows, cols
            fallback = (rows, cols)   # ends at smallest cols / largest rows
    return fallback


def _row_block(rows: int, cols: int, itemsize: int) -> int:
    if rows <= 8:
        return rows                   # full-extent block (satisfies (8,128) rule)
    target = max(8, _TARGET_BLOCK_BYTES // (cols * itemsize))
    block = min(rows, target)
    return max(8, (block // 8) * 8)   # multiple of 8 sublanes


def _pallas_add_2d(x2: jnp.ndarray, pe2: jnp.ndarray) -> jnp.ndarray:
    rows, cols = x2.shape
    block_rows = _row_block(rows, cols, x2.dtype.itemsize)
    grid = (pl.cdiv(rows, block_rows),)
    return pl.pallas_call(
        _add_kernel,
        out_shape=jax.ShapeDtypeStruct((rows, cols), x2.dtype),
        grid_spec=pltpu.PrefetchScalarGridSpec(
            num_scalar_prefetch=0,
            grid=grid,
            in_specs=[
                pl.BlockSpec((block_rows, cols), lambda i: (i, 0)),
                pl.BlockSpec((block_rows, cols), lambda i: (i, 0)),
            ],
            out_specs=pl.BlockSpec((block_rows, cols), lambda i: (i, 0)),
        ),
        compiler_params=pltpu.CompilerParams(
            dimension_semantics=("parallel",),
        ),
        # Note: input_output_aliases={0: 0} could donate x's buffer in real
        # pipelines where x is dead after this op; omitted here so x stays
        # valid for the reference check.
    )(x2, pe2)


def position_encoding(x: jnp.ndarray, pe_table: jnp.ndarray,
                      *, use_pallas=None) -> jnp.ndarray:
    """x: (S, B, D); pe_table: (max_len, 1, D). Returns x + pe[:S]."""
    s, b, d = x.shape
    # Cast + broadcast pe on the wrapper side (tiny, static) so the kernel is
    # a same-dtype, same-shape add.
    pe = jnp.broadcast_to(pe_table[:s].astype(x.dtype), (s, b, d))

    total = s * b * d
    nbytes = total * x.dtype.itemsize
    if use_pallas is None:
        use_pallas = nbytes >= _PALLAS_MIN_BYTES
    if not use_pallas:
        return x + pe                 # let XLA fuse tiny adds

    layout = _lane_dense_layout(total)
    if layout is not None:
        rows, cols = layout
        out2 = _pallas_add_2d(x.reshape(rows, cols), pe.reshape(rows, cols))
        return out2.reshape(s, b, d)

    # Fallback for element counts not divisible by 128: keep (S, B, D) with the
    # last two block dims equal to the full array dims and tile over S so the
    # pipeline still double-buffers.
    block_s = max(1, min(s, _TARGET_BLOCK_BYTES // max(1, b * d * x.dtype.itemsize)))
    grid = (pl.cdiv(s, block_s),)
    return pl.pallas_call(
        _add_kernel,
        out_shape=jax.ShapeDtypeStruct((s, b, d), x.dtype),
        grid_spec=pltpu.PrefetchScalarGridSpec(
            num_scalar_prefetch=0,
            grid=grid,
            in_specs=[
                pl.BlockSpec((block_s, b, d), lambda i: (i, 0, 0)),
                pl.BlockSpec((block_s, b, d), lambda i: (i, 0, 0)),
            ],
            out_specs=pl.BlockSpec((block_s, b, d), lambda i: (i, 0, 0)),
        ),
        compiler_params=pltpu.CompilerParams(
            dimension_semantics=("parallel",),
        ),
    )(x, pe)


if __name__ == "__main__":
    # Small shapes consistent with the module: seq=8, batch=2, d_model=32.
    S, B, D = 8, 2, 32
    key = jax.random.PRNGKey(0)
    x = jax.random.normal(key, (S, B, D), dtype=jnp.float32)

    pe_table = make_pe_table(D, MAX_LEN)

    # Pure-JAX reference (same math as the PyTorch forward), computed first.
    ref = x + pe_table[:S]

    # Force the Pallas path so the kernel itself is exercised even at this
    # tiny size (the auto-dispatch would hand it to XLA).
    out = position_encoding(x, pe_table, use_pallas=True)
    out = jax.block_until_ready(out)

    assert out.shape == (S, B, D)
    assert jnp.allclose(out, ref, atol=1e-6), "mismatch vs reference"

    print("KERNEL_OK")
</pallas_src>

<mosaic_0001>
module attributes {stable_mosaic.version = 11 : i64} {
  func.func @_add_kernel(%arg0: i32, %arg1: memref<4x128xf32, #tpu.memory_space<vmem>>, %arg2: memref<4x128xf32, #tpu.memory_space<vmem>>, %arg3: memref<4x128xf32, #tpu.memory_space<vmem>>) attributes {dimension_semantics = [#tpu.dimension_semantics<parallel>], iteration_bounds = array<i64: 1>, scalar_prefetch = 0 : i64, scratch_operands = 0 : i64, tpu.core_type = #tpu.core_type<tc>, window_params = [{transform_indices = @transform_0, window_bounds = array<i64: 4, 128>}, {transform_indices = @transform_1, window_bounds = array<i64: 4, 128>}, {transform_indices = @transform_2, window_bounds = array<i64: 4, 128>}]} {
    %c0 = arith.constant 0 : index
    %c0_0 = arith.constant 0 : index
    %0 = vector.load %arg1[%c0, %c0_0] : memref<4x128xf32, #tpu.memory_space<vmem>>, vector<4x128xf32>
    %c0_1 = arith.constant 0 : index
    %c0_2 = arith.constant 0 : index
    %1 = vector.load %arg2[%c0_1, %c0_2] : memref<4x128xf32, #tpu.memory_space<vmem>>, vector<4x128xf32>
    %2 = arith.addf %0, %1 : vector<4x128xf32>
    %c0_3 = arith.constant 0 : index
    %c0_4 = arith.constant 0 : index
    %3 = vector.load %arg3[%c0_3, %c0_4] : memref<4x128xf32, #tpu.memory_space<vmem>>, vector<4x128xf32>
    tpu.vector_store %arg3[%c0_3, %c0_4], %2 {strides = array<i32>} : memref<4x128xf32, #tpu.memory_space<vmem>>, vector<4x128xf32>,
    return
  }
  func.func @transform_0(%arg0: i32) -> (i32, i32) {
    %c0_i32 = arith.constant 0 : i32
    %c0_i32_0 = arith.constant 0 : i32
    return %arg0, %c0_i32 : i32, i32
  }
  func.func @transform_1(%arg0: i32) -> (i32, i32) {
    %c0_i32 = arith.constant 0 : i32
    %c0_i32_0 = arith.constant 0 : i32
    return %arg0, %c0_i32 : i32, i32
  }
  func.func @transform_2(%arg0: i32) -> (i32, i32) {
    %c0_i32 = arith.constant 0 : i32
    %c0_i32_0 = arith.constant 0 : i32
    return %arg0, %c0_i32 : i32, i32
  }
}

</mosaic_0001>

<bundles_post_ra>
// kernel: tpu_custom_call.1
= control target key start
LH: loop header
LB: loop body
LE: loop exit
PB: predicated region body
PF: predicated region fallthrough
CT: control target
= control target key end

     0   :  { %7 = vsyncpa [#allocation3], 0  ;;  %s152_s0 = inlined_call_operand.hbm [shape: f32[4,128], index: 0, kind: input, shape index: {}]   ;;  %s153_s1 = inlined_call_operand.hbm [shape: f32[4,128], index: 1, kind: input, shape index: {}]   ;;  %s154_s2 = inlined_call_operand.hbm [shape: f32[4,128], index: 2, kind: output, shape index: {}]  }
   0x1   :  { %8 = vsyncpa [#allocation6], 0 }
   0x2   :  { %9 = vsyncpa [#allocation4], 0  ;;  %s125_s9 = smov [#allocation2]   ;;  %s126_s11 = smov [#allocation5]  }
   0x3   :  { %s16_s10 = sshll.u32 %s125_s9, 4  ;;  %s26_s12 = sshll.u32 %s126_s11, 4  ;;  %s17_s10 = int_to_ptr.vmem [resolvable:$true] %s16_s10  ;;  %s27_s12 = int_to_ptr.vmem [resolvable:$true] %s26_s12 }
   0x4   :  { %s67_s13 = scalar_lea.vmem %s17_s10, 64  ;;  %p72_p1 = scmp.lt.s32.totalorder %s17_s10, %s17_s10 }
   0x5   :  { %p68_p0 = scmp.ne.s32.totalorder %s17_s10, %s67_s13  ;;  %p73_p2 = scmp.lt.s32.totalorder %s67_s13, %s67_s13 }
   0x7   :  { %p74_p3 = por %p73_p2, %p72_p1 }
   0x9   :  { %p75_p4 = pnand %p74_p3, %p68_p0 }
   0xb   :  { %78 = shalt.err (!%p75_p4)
}
   0xc   :  { %19 = dma.hbm_to_vmem [thread:$0]  %s152_s0, 64, %s17_s10, [#allocation3]  }
   0xd   :  { %s87_s16 = scalar_lea.vmem %s27_s12, 64  ;;  %p92_p6 = scmp.lt.s32.totalorder %s27_s12, %s27_s12 }
   0xe   :  { %p88_p5 = scmp.ne.s32.totalorder %s27_s12, %s87_s16  ;;  %p93_p7 = scmp.lt.s32.totalorder %s87_s16, %s87_s16 }
  0x10   :  { %p94_p8 = por %p93_p7, %p92_p6 }
  0x12   :  { %p95_p9 = pnand %p94_p8, %p88_p5 }
  0x14   :  { %98 = shalt.err (!%p95_p9)
}
  0x15   :  { %29 = dma.hbm_to_vmem [thread:$0]  %s153_s1, 64, %s27_s12, [#allocation6]  }
  0x16   :  { %119 = dma.done.wait [#allocation3], 64  }
  0x17   :  { %120 = vsyncadd [#allocation3], 4294967232 }
  0x18   :  { %121 = dma.done.wait [#allocation6], 64  }
  0x19   :  { %122 = vsyncadd [#allocation6], 4294967232  ;;  %s127_s19 = smov [#allocation7]   ;;  %v36_v0 = vld [vmem:[#allocation2] sm:$0xf] }
  0x1a   :  { %s46_s20 = sshll.u32 %s127_s19, 4  ;;  %v37_v1 = vld [vmem:[#allocation5] sm:$0xf]  ;;  %s47_s20 = int_to_ptr.vmem [resolvable:$true] %s46_s20 }
  0x1b   :  { %v38_v2 = vadd.f32 %v37_v1, %v36_v0  ;;  %s99_s0 = scalar_lea.vmem %s47_s20, 64  ;;  %p104_p11 = scmp.lt.s32.totalorder %s47_s20, %s47_s20 }
  0x1c   :  { %p100_p10 = scmp.ne.s32.totalorder %s47_s20, %s99_s0  ;;  %p105_p12 = scmp.lt.s32.totalorder %s99_s0, %s99_s0 }
  0x1d   :  { %39 = vst [vmem:[#allocation7] sm:$0xf] %v38_v2 }
  0x1e   :  { %p106_p13 = por %p105_p12, %p104_p11 }
  0x20   :  { %p107_p0 = pnand %p106_p13, %p100_p10 }
  0x22   :  { %110 = shalt.err (!%p107_p0)
}
  0x23   :  { %49 = dma.vmem_to_hbm [thread:$0]  %s47_s20, 64, %s154_s2, [#allocation4]  }
  0x24   :  { %123 = dma.done.wait [#allocation4], 64  }
  0x25   :  { %124 = vsyncadd [#allocation4], 4294967232 }
  0x26   :  { %53 = vsyncpa [#allocation3], 1 }
  0x27   :  { %54 = vsyncpa [#allocation6], 1 }
  0x28   :  { %55 = vsyncpa [#allocation4], 1 }

</bundles_post_ra>
